<compile_context>
chip_gen: v5e
topology: v5e:2x2
jax: 0.10.0
libtpu: 0.0.40
codegen_flags: <defaults>
</compile_context>

<pallas_src>
import functools

import jax
import jax.numpy as jnp
from jax.experimental import pallas as pl
from jax.experimental.pallas import tpu as pltpu


def _round_up(x, m):
    return ((x + m - 1) // m) * m


def _cdiv(a, b):
    return (a + b - 1) // b


def _pad2d(x, rows, cols):
    """Zero-pad up to (rows, cols); never slices (extra rows/cols are kept)."""
    r, c = x.shape
    pr, pc = max(rows - r, 0), max(cols - c, 0)
    if pr == 0 and pc == 0:
        return x
    return jnp.pad(x, ((0, pr), (0, pc)))


# ---------------------------------------------------------------------------
# Kernel 1: fused projection  hW = h @ [W_self | W_neigh]   (bf16 in, bf16 out)
# ---------------------------------------------------------------------------
def _proj_kernel(h_ref, w_ref, o_ref):
    o_ref[...] = jnp.dot(h_ref[...], w_ref[...],
                         preferred_element_type=jnp.float32).astype(o_ref.dtype)


def fused_projection(h_p, w_cat_p, *, tr):
    rows, pad_in = h_p.shape
    _, n2 = w_cat_p.shape
    return pl.pallas_call(
        _proj_kernel,
        out_shape=jax.ShapeDtypeStruct((rows, n2), jnp.bfloat16),
        grid=(rows // tr,),
        in_specs=[
            pl.BlockSpec((tr, pad_in), lambda r: (r, 0)),   # h row tile
            pl.BlockSpec((pad_in, n2), lambda r: (0, 0)),   # [W_self | W_neigh] resident
        ],
        out_specs=pl.BlockSpec((tr, n2), lambda r: (r, 0)),
        compiler_params=pltpu.CompilerParams(
            dimension_semantics=("parallel",),
            vmem_limit_bytes=32 * 1024 * 1024),
        cost_estimate=pl.CostEstimate(
            flops=2 * rows * pad_in * n2,
            transcendentals=0,
            bytes_accessed=2 * (rows * pad_in + pad_in * n2 + rows * n2)),
    )(h_p, w_cat_p)


# ---------------------------------------------------------------------------
# Kernel 2: aggregation  out = hW_self + inv_deg * (M @ hW_neigh) + bias  (+ReLU)
# ---------------------------------------------------------------------------
def _agg_kernel(m_ref, hwn_ref, hws_ref, inv_ref, b_ref, o_ref, acc_ref,
                *, apply_relu):
    k = pl.program_id(1)

    @pl.when(k == 0)
    def _():
        acc_ref[...] = jnp.zeros_like(acc_ref)

    # neighbor sum: exact 0/1 bf16 mask x pre-projected bf16 features, f32 MXU accumulate
    acc_ref[...] += jnp.dot(m_ref[...], hwn_ref[...],
                            preferred_element_type=jnp.float32)

    @pl.when(k == pl.num_programs(1) - 1)
    def _():
        out = (hws_ref[...].astype(jnp.float32)     # self projection (dst prefix rows)
               + inv_ref[...] * acc_ref[...]        # exact f32 mean via inverse degree
               + b_ref[...])                        # f32 bias
        if apply_relu:
            out = jnp.maximum(out, 0.0)
        o_ref[...] = out.astype(o_ref.dtype)        # lane-dense writeback


def sage_aggregate(mask_p, inv_p, hw_p, bias_p, plan, *, apply_relu, out_dtype):
    TM, TK = plan["tm"], plan["tk"]
    pad_dst, pad_src, pad_out = plan["pad_dst"], plan["pad_src"], plan["pad_out"]
    grid = (pad_dst // TM, pad_src // TK)   # dst tiles parallel, src/K reduction last

    kernel = functools.partial(_agg_kernel, apply_relu=apply_relu)
    return pl.pallas_call(
        kernel,
        out_shape=jax.ShapeDtypeStruct((pad_dst, pad_out), out_dtype),
        grid=grid,
        in_specs=[
            pl.BlockSpec((TM, TK), lambda i, k: (i, k)),         # 0/1 mask tile (bf16)
            pl.BlockSpec((TK, pad_out), lambda i, k: (k, 1)),    # hW_neigh (right half of hW)
            pl.BlockSpec((TM, pad_out), lambda i, k: (i, 0)),    # hW_self  (left half, dst prefix)
            pl.BlockSpec((TM, 1), lambda i, k: (i, 0)),          # inverse degree (f32)
            pl.BlockSpec((1, pad_out), lambda i, k: (0, 0)),     # bias (f32, resident)
        ],
        out_specs=pl.BlockSpec((TM, pad_out), lambda i, k: (i, 0)),
        scratch_shapes=[pltpu.VMEM((TM, pad_out), jnp.float32)],
        compiler_params=pltpu.CompilerParams(
            dimension_semantics=("parallel", "arbitrary"),
            vmem_limit_bytes=32 * 1024 * 1024),
        cost_estimate=pl.CostEstimate(
            flops=2 * pad_dst * pad_src * pad_out,
            transcendentals=0,
            bytes_accessed=(pad_dst * pad_src * 2        # mask
                            + pad_src * pad_out * 2      # hW_neigh
                            + pad_dst * pad_out * 2      # hW_self
                            + pad_dst * pad_out * out_dtype.dtype.itemsize
                            if hasattr(out_dtype, "dtype") else
                            pad_dst * pad_src * 2 + pad_src * pad_out * 2
                            + pad_dst * pad_out * 2 + pad_dst * pad_out * 4)),
    )(mask_p, hw_p, hw_p, inv_p, bias_p)


# ---------------------------------------------------------------------------
# Per-layer tiling plan + one-time preprocessing (padding/casting outside the fwd path)
# ---------------------------------------------------------------------------
def plan_layer(num_dst, num_src, in_dim, out_dim, *,
               tm_target=512, tk_target=1024, tr=256, min_dst_tiles=2):
    TM = min(tm_target, _round_up(num_dst, 8))
    # keep >=2 dst tiles when possible so the "parallel" axis feeds both v7x TensorCores
    if num_dst >= 2 * 8 and _round_up(num_dst, TM) // TM < min_dst_tiles:
        TM = _round_up(_cdiv(num_dst, min_dst_tiles), 8)
    TK = min(tk_target, _round_up(num_src, 128))
    pad_dst = _round_up(num_dst, TM)
    pad_src = _round_up(num_src, TK)
    pad_in = _round_up(in_dim, 128)
    pad_out = _round_up(out_dim, 128)
    h_rows = _round_up(max(pad_src, pad_dst), tr)
    return dict(num_dst=num_dst, num_src=num_src, in_dim=in_dim, out_dim=out_dim,
                tm=TM, tk=TK, tr=tr, pad_dst=pad_dst, pad_src=pad_src,
                pad_in=pad_in, pad_out=pad_out, h_rows=h_rows)


def prepare(blocks_adj, params, *, tm_target=512, tk_target=1024):
    """Pad/cast blocks and weights once so the per-forward path reads them directly."""
    prepped = []
    for adj, (w_self, w_neigh, b) in zip(blocks_adj, params):
        num_dst, num_src = adj.shape
        in_dim, out_dim = w_self.shape
        plan = plan_layer(num_dst, num_src, in_dim, out_dim,
                          tm_target=tm_target, tk_target=tk_target)
        mask = (adj > 0).astype(jnp.float32)
        deg = jnp.sum(mask, axis=1, keepdims=True)
        inv = jnp.where(deg > 0, 1.0 / deg, 0.0)
        mask_p = _pad2d(mask.astype(jnp.bfloat16), plan["pad_dst"], plan["pad_src"])
        inv_p = _pad2d(inv, plan["pad_dst"], 1)
        w_cat_p = jnp.concatenate(
            [_pad2d(w_self, plan["pad_in"], plan["pad_out"]),
             _pad2d(w_neigh, plan["pad_in"], plan["pad_out"])],
            axis=1).astype(jnp.bfloat16)
        b_p = _pad2d(b, 1, plan["pad_out"]).astype(jnp.float32)
        prepped.append(dict(plan=plan, mask=mask_p, inv=inv_p, w_cat=w_cat_p, bias=b_p))
    return prepped


# ---------------------------------------------------------------------------
# Forward pass (mirrors SAGE.forward: per-layer SAGEConv, ReLU + dropout(eval) between)
# ---------------------------------------------------------------------------
def sage_forward(prepped, x):
    n_layers = len(prepped)
    h = x.astype(jnp.bfloat16)          # first-layer features cast to bf16 once
    for i, layer in enumerate(prepped):
        plan = layer["plan"]
        rows = max(plan["h_rows"], _round_up(h.shape[0], plan["tr"]))
        h_p = _pad2d(h, rows, plan["pad_in"])            # no-op except first layer / row growth
        hw_p = fused_projection(h_p, layer["w_cat"], tr=plan["tr"])
        last = (i == n_layers - 1)
        h = sage_aggregate(layer["mask"], layer["inv"], hw_p, layer["bias"], plan,
                           apply_relu=not last,
                           out_dtype=jnp.float32 if last else jnp.bfloat16)
        # dropout: identity in eval mode
    final = prepped[-1]["plan"]
    return h[:final["num_dst"], :final["out_dim"]]


# ---------------------------------------------------------------------------
# Pure-JAX reference mirroring the kernel's mixed precision (bf16 hW, exact f32 mean)
# ---------------------------------------------------------------------------
def sage_reference(blocks_adj, x, params):
    h = x.astype(jnp.bfloat16)
    n_layers = len(params)
    for i, (adj, (w_s, w_n, b)) in enumerate(zip(blocks_adj, params)):
        nd = adj.shape[0]
        out_dim = w_s.shape[1]
        mask = (adj > 0).astype(jnp.float32)
        deg = mask.sum(axis=1, keepdims=True)
        inv = jnp.where(deg > 0, 1.0 / deg, 0.0)
        w_cat = jnp.concatenate([w_s, w_n], axis=1).astype(jnp.bfloat16)
        hw = jnp.dot(h.astype(jnp.bfloat16), w_cat,
                     preferred_element_type=jnp.float32).astype(jnp.bfloat16)
        hw_s, hw_n = hw[:, :out_dim], hw[:, out_dim:]
        neigh = jnp.dot(mask.astype(jnp.bfloat16), hw_n,
                        preferred_element_type=jnp.float32)
        out = hw_s[:nd].astype(jnp.float32) + inv * neigh + b
        if i != n_layers - 1:
            out = jnp.maximum(out, 0.0)
            h = out.astype(jnp.bfloat16)
        else:
            h = out
    return h


# ---------------------------------------------------------------------------
# Parameter / block construction
# ---------------------------------------------------------------------------
def init_params(key, in_feats, n_hidden, n_classes, n_layers):
    params = []
    for i in range(n_layers):
        in_dim = in_feats if i == 0 else n_hidden
        out_dim = n_classes if i == n_layers - 1 else n_hidden
        key, k1, k2 = jax.random.split(key, 3)
        w_self = (jax.random.normal(k1, (in_dim, out_dim), jnp.float32)
                  * (1.0 / jnp.sqrt(in_dim)))
        w_neigh = (jax.random.normal(k2, (in_dim, out_dim), jnp.float32)
                   * (1.0 / jnp.sqrt(in_dim)))
        b = jnp.zeros((1, out_dim), jnp.float32)
        params.append((w_self, w_neigh, b))
    return params


def make_block(key, num_dst, num_src):
    """Random bipartite block as a dense 0/1 adjacency (num_dst, num_src)."""
    adj = jax.random.bernoulli(key, 0.5, (num_dst, num_src)).astype(jnp.float32)
    eye = jnp.zeros((num_dst, num_src), jnp.float32).at[
        jnp.arange(num_dst), jnp.arange(num_dst)].set(1.0)
    return jnp.maximum(adj, eye)   # every dst node has at least one neighbor


if __name__ == "__main__":
    in_feats, n_hidden, n_classes, n_layers = 16, 32, 8, 2
    num_src0, num_dst0, num_dst1 = 16, 12, 8   # fan-in shrinks layer by layer

    root = jax.random.PRNGKey(0)
    k_x, k_b0, k_b1, k_p = jax.random.split(root, 4)

    x = jax.random.normal(k_x, (num_src0, in_feats), jnp.float32)
    blocks = [
        make_block(k_b0, num_dst0, num_src0),   # layer 0: 16 src -> 12 dst
        make_block(k_b1, num_dst1, num_dst0),   # layer 1: 12 src ->  8 dst
    ]
    params = init_params(k_p, in_feats, n_hidden, n_classes, n_layers)

    prepped = prepare(blocks, params)
    out = sage_forward(prepped, x)
    out = jax.block_until_ready(out)
    assert out.shape == (num_dst1, n_classes), out.shape

    ref = sage_reference(blocks, x, params)
    err = float(jnp.max(jnp.abs(out - ref)))
    assert jnp.allclose(out, ref, atol=2e-2, rtol=2e-2), err

    print("KERNEL_OK")
</pallas_src>

<mosaic_0001>
module attributes {stable_mosaic.version = 11 : i64} {
  func.func @_proj_kernel(%arg0: i32, %arg1: memref<256x128xbf16, #tpu.memory_space<vmem>>, %arg2: memref<128x256xbf16, #tpu.memory_space<vmem>>, %arg3: memref<256x256xbf16, #tpu.memory_space<vmem>>) attributes {dimension_semantics = [#tpu.dimension_semantics<parallel>], iteration_bounds = array<i64: 1>, scalar_prefetch = 0 : i64, scratch_operands = 0 : i64, tpu.core_type = #tpu.core_type<tc>, window_params = [{transform_indices = @transform_0, window_bounds = array<i64: 256, 128>}, {pipeline_mode = #tpu.pipeline_mode<synchronous>, transform_indices = @transform_1, window_bounds = array<i64: 128, 256>}, {transform_indices = @transform_2, window_bounds = array<i64: 256, 256>}]} {
    %c0 = arith.constant 0 : index
    %c0_0 = arith.constant 0 : index
    %0 = vector.load %arg1[%c0, %c0_0] : memref<256x128xbf16, #tpu.memory_space<vmem>>, vector<256x128xbf16>
    %c0_1 = arith.constant 0 : index
    %c0_2 = arith.constant 0 : index
    %1 = vector.load %arg2[%c0_1, %c0_2] : memref<128x256xbf16, #tpu.memory_space<vmem>>, vector<128x256xbf16>
    %cst = arith.constant dense<0.000000e+00> : vector<256x256xf32>
    %2 = tpu.matmul %0, %1, %cst {dimension_numbers = #tpu.dot_dimension_numbers<[1], [0], [0], [1], [0, 0, 1, 1], [], []>} : vector<256x128xbf16>, vector<128x256xbf16>, vector<256x256xf32> -> vector<256x256xf32>
    %3 = arith.truncf %2 : vector<256x256xf32> to vector<256x256xbf16>
    %c0_3 = arith.constant 0 : index
    %c0_4 = arith.constant 0 : index
    %4 = vector.load %arg3[%c0_3, %c0_4] : memref<256x256xbf16, #tpu.memory_space<vmem>>, vector<256x256xbf16>
    tpu.vector_store %arg3[%c0_3, %c0_4], %3 {strides = array<i32>} : memref<256x256xbf16, #tpu.memory_space<vmem>>, vector<256x256xbf16>,
    return
  }
  func.func @transform_0(%arg0: i32) -> (i32, i32) {
    %c0_i32 = arith.constant 0 : i32
    %c0_i32_0 = arith.constant 0 : i32
    return %arg0, %c0_i32 : i32, i32
  }
  func.func @transform_1(%arg0: i32) -> (i32, i32) {
    %c0_i32 = arith.constant 0 : i32
    %c0_i32_0 = arith.constant 0 : i32
    %c0_i32_1 = arith.constant 0 : i32
    return %c0_i32, %c0_i32_0 : i32, i32
  }
  func.func @transform_2(%arg0: i32) -> (i32, i32) {
    %c0_i32 = arith.constant 0 : i32
    %c0_i32_0 = arith.constant 0 : i32
    return %arg0, %c0_i32 : i32, i32
  }
}

</mosaic_0001>

<bundles_post_ra>
// kernel: tpu_custom_call.1
= control target key start
LH: loop header
LB: loop body
LE: loop exit
PB: predicated region body
PF: predicated region fallthrough
CT: control target
= control target key end

     0   :  { %7 = vsyncpa [#allocation3], 0  ;;  %s828_s0 = inlined_call_operand.hbm [shape: bf16[256,128], index: 0, kind: input, shape index: {}]   ;;  %s829_s1 = inlined_call_operand.hbm [shape: bf16[128,256], index: 1, kind: input, shape index: {}]   ;;  %s830_s2 = inlined_call_operand.hbm [shape: bf16[256,256], index: 2, kind: output, shape index: {}]  }
   0x1   :  { %8 = vsyncpa [#allocation6], 0 }
   0x2   :  { %9 = vsyncpa [#allocation4], 0  ;;  %s14_s11 = sshll.u32 %s828_s0, 4  ;;  %s791_s12 = smov [#allocation2]   ;;  %s15_s11 = int_to_ptr.hbm [resolvable:$true] %s14_s11 }
   0x3   :  { %s16_s13 = sshll.u32 %s791_s12, 4  ;;  %s27_s16 = sshll.u32 %s829_s1, 4  ;;  %s17_s13 = int_to_ptr.vmem [resolvable:$true] %s16_s13  ;;  %s28_s16 = int_to_ptr.hbm [resolvable:$true] %s27_s16 }
   0x4   :  { %s792_s17 = smov 64   ;;  %s793_s18 = smov 4  }
   0x5   :  { %22 = dma.hbm_to_vmem [thread:$0]  %s15_s11, 2048, %s17_s13, [#allocation3], %s792_s17, %s792_s17, %s793_s18  }
   0x6   :  { %s794_s19 = smov [#allocation5]   ;;  %s795_s21 = smov 128  }
   0x7   :  { %s29_s20 = sshll.u32 %s794_s19, 4  ;;  %s796_s22 = smov 8   ;;  %s30_s20 = int_to_ptr.vmem [resolvable:$true] %s29_s20 }
   0x8   :  { %35 = dma.hbm_to_vmem [thread:$0]  %s28_s16, 2048, %s30_s20, [#allocation6], %s795_s21, %s795_s21, %s796_s22  }
   0x9   :  { %785 = dma.done.wait [#allocation3], 2048  }
   0xa   :  { %786 = vsyncadd [#allocation3], 4294965248 }
   0xb   :  { %787 = dma.done.wait [#allocation6], 2048  }
   0xc   :  { %788 = vsyncadd [#allocation6], 4294965248  ;;  %v652_v0 = vld [vmem:[#allocation5 + $0x70] sm:$0xf]  ;;  %v689_v1 = vld [vmem:[#allocation5 + $0x74] sm:$0xf0] }
   0xd   :  { %v688_v2 = vld [vmem:[#allocation5 + $0x74] sm:$0xf]  ;;  %v653_v3 = vor.u32 %v689_v1, %v652_v0  ;;  %v654_v4 = vld [vmem:[#allocation5 + $0x78] sm:$0xf0]  ;;  %v644_v5 = vld [vmem:[#allocation5 + $0x60] sm:$0xf] }
   0xe   :  { %v687_v6 = vld [vmem:[#allocation5 + $0x64] sm:$0xf0]  ;;  %v657_v7 = vor.u32 %v688_v2, %v654_v4  ;;  %v686_v8 = vld [vmem:[#allocation5 + $0x64] sm:$0xf]  ;;  %v646_v9 = vld [vmem:[#allocation5 + $0x68] sm:$0xf0] }
   0xf   :  { %268 = vmatpush.bf16.msra.mxu0 %v653_v3  ;;  %690 = vmatpush.bf16.msra.mxu2 %v653_v3  ;;  %v645_v10 = vor.u32 %v687_v6, %v644_v5  ;;  %v649_v11 = vor.u32 %v686_v8, %v646_v9  ;;  %v636_v12 = vld [vmem:[#allocation5 + $0x50] sm:$0xf]  ;;  %v685_v13 = vld [vmem:[#allocation5 + $0x54] sm:$0xf0]  ;;  %v684_v14 = vld [vmem:[#allocation5 + $0x54] sm:$0xf] }
  0x10   :  { %357 = vmatpush.bf16.msra.mxu1 %v657_v7  ;;  %698 = vmatpush.bf16.msra.mxu3 %v657_v7  ;;  %v638_v15 = vld [vmem:[#allocation5 + $0x58] sm:$0xf0]  ;;  %v637_v16 = vor.u32 %v685_v13, %v636_v12  ;;  %v628_v18 = vld [vmem:[#allocation5 + $0x40] sm:$0xf]  ;;  %v683_v19 = vld [vmem:[#allocation5 + $0x44] sm:$0xf0] }
  0x11   :  { %v641_v17 = vor.u32 %v684_v14, %v638_v15  ;;  %v682_v20 = vld [vmem:[#allocation5 + $0x44] sm:$0xf]  ;;  %v630_v21 = vld [vmem:[#allocation5 + $0x48] sm:$0xf0]  ;;  %v629_v22 = vor.u32 %v683_v19, %v628_v18  ;;  %v620_v24 = vld [vmem:[#allocation5 + $0x30] sm:$0xf] }
  0x12   :  { %v633_v23 = vor.u32 %v682_v20, %v630_v21  ;;  %v681_v25 = vld [vmem:[#allocation5 + $0x34] sm:$0xf0]  ;;  %v680_v26 = vld [vmem:[#allocation5 + $0x34] sm:$0xf]  ;;  %v622_v27 = vld [vmem:[#allocation5 + $0x38] sm:$0xf0] }
  0x13   :  { %269 = vmatpush.bf16.msra.mxu0 %v645_v10  ;;  %691 = vmatpush.bf16.msra.mxu2 %v645_v10  ;;  %v621_v28 = vor.u32 %v681_v25, %v620_v24  ;;  %v625_v29 = vor.u32 %v680_v26, %v622_v27  ;;  %v612_v30 = vld [vmem:[#allocation5 + $0x20] sm:$0xf]  ;;  %v679_v31 = vld [vmem:[#allocation5 + $0x24] sm:$0xf0]  ;;  %v678_v32 = vld [vmem:[#allocation5 + $0x24] sm:$0xf] }
  0x14   :  { %358 = vmatpush.bf16.msra.mxu1 %v649_v11  ;;  %699 = vmatpush.bf16.msra.mxu3 %v649_v11  ;;  %v614_v33 = vld [vmem:[#allocation5 + $0x28] sm:$0xf0]  ;;  %v613_v34 = vor.u32 %v679_v31, %v612_v30  ;;  %v604_v36 = vld [vmem:[#allocation5 + $0x10] sm:$0xf]  ;;  %v677_v37 = vld [vmem:[#allocation5 + $0x14] sm:$0xf0] }
  0x15   :  { %v617_v35 = vor.u32 %v678_v32, %v614_v33  ;;  %v676_v38 = vld [vmem:[#allocation5 + $0x14] sm:$0xf]  ;;  %v606_v39 = vld [vmem:[#allocation5 + $0x18] sm:$0xf0]  ;;  %v605_v40 = vor.u32 %v677_v37, %v604_v36  ;;  %v596_v42 = vld [vmem:[#allocation5] sm:$0xf] }
  0x16   :  { %v609_v41 = vor.u32 %v676_v38, %v606_v39  ;;  %v675_v43 = vld [vmem:[#allocation5 + $0x4] sm:$0xf0]  ;;  %v674_v44 = vld [vmem:[#allocation5 + $0x4] sm:$0xf]  ;;  %v598_v45 = vld [vmem:[#allocation5 + $0x8] sm:$0xf0] }
  0x17   :  { %270 = vmatpush.bf16.msra.mxu0 %v637_v16  ;;  %692 = vmatpush.bf16.msra.mxu2 %v637_v16  ;;  %v597_v46 = vor.u32 %v675_v43, %v596_v42  ;;  %v601_v47 = vor.u32 %v674_v44, %v598_v45  ;;  %v658_v48 = vld [vmem:[#allocation2] sm:$0xff]  ;;  %v659_v50 = vld [vmem:[#allocation2 + $0x8] sm:$0xff]  ;;  %v660_v52 = vld [vmem:[#allocation2 + $0x10] sm:$0xff]  ;;  %s797_s0 = smov [#allocation7]   ;;  %s516_s25 = sshll.u32 %s830_s2, 4  ;;  %s517_s25 = int_to_ptr.hbm [resolvable:$true] %s516_s25 }
  0x18   :  { %359 = vmatpush.bf16.msra.mxu1 %v641_v17  ;;  %700 = vmatpush.bf16.msra.mxu3 %v641_v17  ;;  %v666_v49 = vld [vmem:[#allocation2 + $0x40] sm:$0xff]  ;;  %v667_v51 = vld [vmem:[#allocation2 + $0x48] sm:$0xff]  ;;  %v668_v53 = vld [vmem:[#allocation2 + $0x50] sm:$0xff]  ;;  %s514_s1 = sshll.u32 %s797_s0, 4  ;;  %s515_s1 = int_to_ptr.vmem [resolvable:$true] %s514_s1 }
  0x19   :  { %v661_v54 = vld [vmem:[#allocation2 + $0x18] sm:$0xff]  ;;  %v662_v56 = vld [vmem:[#allocation2 + $0x20] sm:$0xff]  ;;  %v663_v58 = vld [vmem:[#allocation2 + $0x28] sm:$0xff] }
  0x1a   :  { %v669_v55 = vld [vmem:[#allocation2 + $0x58] sm:$0xff]  ;;  %v670_v57 = vld [vmem:[#allocation2 + $0x60] sm:$0xff]  ;;  %v671_v59 = vld [vmem:[#allocation2 + $0x68] sm:$0xff] }
  0x1b   :  { %271 = vmatpush.bf16.msra.mxu0 %v629_v22  ;;  %693 = vmatpush.bf16.msra.mxu2 %v629_v22  ;;  %v664_v60 = vld [vmem:[#allocation2 + $0x30] sm:$0xff]  ;;  %v665_v62 = vld [vmem:[#allocation2 + $0x38] sm:$0xff] }
  0x1c   :  { %360 = vmatpush.bf16.msra.mxu1 %v633_v23  ;;  %701 = vmatpush.bf16.msra.mxu3 %v633_v23  ;;  %v672_v61 = vld [vmem:[#allocation2 + $0x70] sm:$0xff]  ;;  %v673_v63 = vld [vmem:[#allocation2 + $0x78] sm:$0xff] }
  0x1f   :  { %272 = vmatpush.bf16.msra.mxu0 %v621_v28  ;;  %694 = vmatpush.bf16.msra.mxu2 %v621_v28 }
  0x20   :  { %361 = vmatpush.bf16.msra.mxu1 %v625_v29  ;;  %702 = vmatpush.bf16.msra.mxu3 %v625_v29 }
  0x23   :  { %273 = vmatpush.bf16.msra.mxu0 %v613_v34  ;;  %695 = vmatpush.bf16.msra.mxu2 %v613_v34 }
  0x24   :  { %362 = vmatpush.bf16.msra.mxu1 %v617_v35  ;;  %703 = vmatpush.bf16.msra.mxu3 %v617_v35 }
  0x27   :  { %274 = vmatpush.bf16.msra.mxu0 %v605_v40  ;;  %696 = vmatpush.bf16.msra.mxu2 %v605_v40 }
  0x28   :  { %363 = vmatpush.bf16.msra.mxu1 %v609_v41  ;;  %704 = vmatpush.bf16.msra.mxu3 %v609_v41 }
  0x2b   :  { %275 = vmatpush.bf16.msra.mxu0 %v597_v46  ;;  %697 = vmatpush.bf16.msra.mxu2 %v597_v46 }
  0x2c   :  { %364 = vmatpush.bf16.msra.mxu1 %v601_v47  ;;  %705 = vmatpush.bf16.msra.mxu3 %v601_v47 }
  0x2e   :  { %276 = vmatmul.bf16.vlgmr.msra.gmra.mxu0 %v658_v48  ;;  %316 = vmatmul.bf16.vlgmr.msra.gmra.mxu2 %v666_v49 }
  0x2f   :  { %365 = vmatmul.bf16.vlgmr.msra.gmra.mxu1 %v658_v48  ;;  %405 = vmatmul.bf16.vlgmr.msra.gmra.mxu3 %v666_v49 }
  0x3e   :  { %281 = vmatmul.bf16.gmra.mxu0 %v659_v50  ;;  %321 = vmatmul.bf16.gmra.mxu2 %v667_v51 }
  0x3f   :  { %370 = vmatmul.bf16.gmra.mxu1 %v659_v50  ;;  %410 = vmatmul.bf16.gmra.mxu3 %v667_v51 }
  0x4e   :  { %286 = vmatmul.bf16.gmra.mxu0 %v660_v52  ;;  %326 = vmatmul.bf16.gmra.mxu2 %v668_v53 }
  0x4f   :  { %375 = vmatmul.bf16.gmra.mxu1 %v660_v52  ;;  %415 = vmatmul.bf16.gmra.mxu3 %v668_v53 }
  0x5e   :  { %291 = vmatmul.bf16.gmra.mxu0 %v661_v54  ;;  %331 = vmatmul.bf16.gmra.mxu2 %v669_v55 }
  0x5f   :  { %380 = vmatmul.bf16.gmra.mxu1 %v661_v54  ;;  %420 = vmatmul.bf16.gmra.mxu3 %v669_v55 }
  0x6e   :  { %296 = vmatmul.bf16.gmra.mxu0 %v662_v56  ;;  %336 = vmatmul.bf16.gmra.mxu2 %v670_v57 }
  0x6f   :  { %385 = vmatmul.bf16.gmra.mxu1 %v662_v56  ;;  %425 = vmatmul.bf16.gmra.mxu3 %v670_v57 }
  0x7e   :  { %301 = vmatmul.bf16.gmra.mxu0 %v663_v58  ;;  %341 = vmatmul.bf16.gmra.mxu2 %v671_v59 }
  0x7f   :  { %390 = vmatmul.bf16.gmra.mxu1 %v663_v58  ;;  %430 = vmatmul.bf16.gmra.mxu3 %v671_v59 }
  0x8e   :  { %306 = vmatmul.bf16.gmra.mxu0 %v664_v60  ;;  %346 = vmatmul.bf16.gmra.mxu2 %v672_v61 }
  0x8f   :  { %395 = vmatmul.bf16.gmra.mxu1 %v664_v60  ;;  %435 = vmatmul.bf16.gmra.mxu3 %v672_v61 }
  0x9e   :  { %311 = vmatmul.bf16.gmra.mxu0 %v665_v62  ;;  %351 = vmatmul.bf16.gmra.mxu2 %v673_v63 }
  0x9f   :  { %400 = vmatmul.bf16.gmra.mxu1 %v665_v62  ;;  %440 = vmatmul.bf16.gmra.mxu3 %v673_v63 }
  0xab   :  { %v277_v0 = vpop.f32.mrf.mxu0 }
  0xac   :  { %v366_v1 = vpop.f32.mrf.mxu1 }
  0xad   :  { %v446_v2 = vpack.c.bf16 %v366_v1, %v277_v0 }
  0xaf   :  { %478 = vst [vmem:[#allocation7] sm:$0xff] %v446_v2 }
  0xb1   :  { %v317_v3 = vpop.f32.mrf.mxu2 }
  0xb2   :  { %v406_v4 = vpop.f32.mrf.mxu3 }
  0xb3   :  { %v462_v5 = vpack.c.bf16 %v406_v4, %v317_v3  ;;  %v279_v6 = vpop.f32.mrf.mxu0 }
  0xb4   :  { %v368_v7 = vpop.f32.mrf.mxu1 }
  0xb5   :  { %494 = vst [vmem:[#allocation7 + $0x80] sm:$0xff] %v462_v5  ;;  %v447_v8 = vpack.c.bf16 %v368_v7, %v279_v6 }
  0xb7   :  { %479 = vst [vmem:[#allocation7 + $0x8] sm:$0xff] %v447_v8 }
  0xb9   :  { %v319_v9 = vpop.f32.mrf.mxu2 }
  0xba   :  { %v408_v10 = vpop.f32.mrf.mxu3 }
  0xbb   :  { %v463_v11 = vpack.c.bf16 %v408_v10, %v319_v9  ;;  %v282_v12 = vpop.f32.mrf.mxu0 }
  0xbc   :  { %v371_v13 = vpop.f32.mrf.mxu1 }
  0xbd   :  { %495 = vst [vmem:[#allocation7 + $0x88] sm:$0xff] %v463_v11  ;;  %v448_v14 = vpack.c.bf16 %v371_v13, %v282_v12 }
  0xbf   :  { %480 = vst [vmem:[#allocation7 + $0x10] sm:$0xff] %v448_v14 }
  0xc1   :  { %v322_v15 = vpop.f32.mrf.mxu2 }
  0xc2   :  { %v411_v16 = vpop.f32.mrf.mxu3 }
  0xc3   :  { %v464_v17 = vpack.c.bf16 %v411_v16, %v322_v15  ;;  %v284_v18 = vpop.f32.mrf.mxu0 }
  0xc4   :  { %v373_v19 = vpop.f32.mrf.mxu1 }
  0xc5   :  { %496 = vst [vmem:[#allocation7 + $0x90] sm:$0xff] %v464_v17  ;;  %v449_v20 = vpack.c.bf16 %v373_v19, %v284_v18 }
  0xc7   :  { %481 = vst [vmem:[#allocation7 + $0x18] sm:$0xff] %v449_v20 }
  0xc9   :  { %v324_v21 = vpop.f32.mrf.mxu2 }
  0xca   :  { %v413_v22 = vpop.f32.mrf.mxu3 }
  0xcb   :  { %v465_v23 = vpack.c.bf16 %v413_v22, %v324_v21  ;;  %v287_v24 = vpop.f32.mrf.mxu0 }
  0xcc   :  { %v376_v25 = vpop.f32.mrf.mxu1 }
  0xcd   :  { %497 = vst [vmem:[#allocation7 + $0x98] sm:$0xff] %v465_v23  ;;  %v450_v26 = vpack.c.bf16 %v376_v25, %v287_v24 }
  0xcf   :  { %482 = vst [vmem:[#allocation7 + $0x20] sm:$0xff] %v450_v26 }
  0xd1   :  { %v327_v27 = vpop.f32.mrf.mxu2 }
  0xd2   :  { %v416_v28 = vpop.f32.mrf.mxu3 }
  0xd3   :  { %v466_v29 = vpack.c.bf16 %v416_v28, %v327_v27  ;;  %v289_v30 = vpop.f32.mrf.mxu0 }
  0xd4   :  { %v378_v31 = vpop.f32.mrf.mxu1 }
  0xd5   :  { %498 = vst [vmem:[#allocation7 + $0xa0] sm:$0xff] %v466_v29  ;;  %v451_v32 = vpack.c.bf16 %v378_v31, %v289_v30 }
  0xd7   :  { %483 = vst [vmem:[#allocation7 + $0x28] sm:$0xff] %v451_v32 }
  0xd9   :  { %v329_v33 = vpop.f32.mrf.mxu2 }
  0xda   :  { %v418_v34 = vpop.f32.mrf.mxu3 }
  0xdb   :  { %v467_v35 = vpack.c.bf16 %v418_v34, %v329_v33  ;;  %v292_v36 = vpop.f32.mrf.mxu0 }
  0xdc   :  { %v381_v37 = vpop.f32.mrf.mxu1 }
  0xdd   :  { %499 = vst [vmem:[#allocation7 + $0xa8] sm:$0xff] %v467_v35  ;;  %v452_v38 = vpack.c.bf16 %v381_v37, %v292_v36 }
  0xdf   :  { %484 = vst [vmem:[#allocation7 + $0x30] sm:$0xff] %v452_v38 }
  0xe1   :  { %v332_v39 = vpop.f32.mrf.mxu2 }
  0xe2   :  { %v421_v40 = vpop.f32.mrf.mxu3 }
  0xe3   :  { %v468_v41 = vpack.c.bf16 %v421_v40, %v332_v39  ;;  %v294_v42 = vpop.f32.mrf.mxu0 }
  0xe4   :  { %v383_v43 = vpop.f32.mrf.mxu1 }
  0xe5   :  { %500 = vst [vmem:[#allocation7 + $0xb0] sm:$0xff] %v468_v41  ;;  %v453_v44 = vpack.c.bf16 %v383_v43, %v294_v42 }
  0xe7   :  { %485 = vst [vmem:[#allocation7 + $0x38] sm:$0xff] %v453_v44 }
  0xe9   :  { %v334_v45 = vpop.f32.mrf.mxu2 }
  0xea   :  { %v423_v46 = vpop.f32.mrf.mxu3 }
  0xeb   :  { %v469_v47 = vpack.c.bf16 %v423_v46, %v334_v45  ;;  %v297_v48 = vpop.f32.mrf.mxu0 }
  0xec   :  { %v386_v49 = vpop.f32.mrf.mxu1 }
  0xed   :  { %501 = vst [vmem:[#allocation7 + $0xb8] sm:$0xff] %v469_v47  ;;  %v454_v50 = vpack.c.bf16 %v386_v49, %v297_v48 }
  0xef   :  { %486 = vst [vmem:[#allocation7 + $0x40] sm:$0xff] %v454_v50 }
  0xf1   :  { %v337_v51 = vpop.f32.mrf.mxu2 }
  0xf2   :  { %v426_v52 = vpop.f32.mrf.mxu3 }
  0xf3   :  { %v470_v53 = vpack.c.bf16 %v426_v52, %v337_v51  ;;  %v299_v54 = vpop.f32.mrf.mxu0 }
  0xf4   :  { %v388_v55 = vpop.f32.mrf.mxu1 }
  0xf5   :  { %502 = vst [vmem:[#allocation7 + $0xc0] sm:$0xff] %v470_v53  ;;  %v455_v56 = vpack.c.bf16 %v388_v55, %v299_v54 }
  0xf7   :  { %487 = vst [vmem:[#allocation7 + $0x48] sm:$0xff] %v455_v56 }
  0xf9   :  { %v339_v57 = vpop.f32.mrf.mxu2 }
  0xfa   :  { %v428_v58 = vpop.f32.mrf.mxu3 }
  0xfb   :  { %v471_v59 = vpack.c.bf16 %v428_v58, %v339_v57  ;;  %v302_v60 = vpop.f32.mrf.mxu0 }
  0xfc   :  { %v391_v61 = vpop.f32.mrf.mxu1 }
  0xfd   :  { %503 = vst [vmem:[#allocation7 + $0xc8] sm:$0xff] %v471_v59  ;;  %v456_v62 = vpack.c.bf16 %v391_v61, %v302_v60 }
  0xff   :  { %488 = vst [vmem:[#allocation7 + $0x50] sm:$0xff] %v456_v62 }
 0x101   :  { %v342_v63 = vpop.f32.mrf.mxu2 }
 0x102   :  { %v431_v0 = vpop.f32.mrf.mxu3 }
 0x103   :  { %v472_v1 = vpack.c.bf16 %v431_v0, %v342_v63  ;;  %v304_v2 = vpop.f32.mrf.mxu0 }
 0x104   :  { %v393_v3 = vpop.f32.mrf.mxu1 }
 0x105   :  { %504 = vst [vmem:[#allocation7 + $0xd0] sm:$0xff] %v472_v1  ;;  %v457_v4 = vpack.c.bf16 %v393_v3, %v304_v2 }
 0x107   :  { %489 = vst [vmem:[#allocation7 + $0x58] sm:$0xff] %v457_v4 }
 0x109   :  { %v344_v5 = vpop.f32.mrf.mxu2 }
 0x10a   :  { %v433_v6 = vpop.f32.mrf.mxu3 }
 0x10b   :  { %v473_v7 = vpack.c.bf16 %v433_v6, %v344_v5  ;;  %v307_v8 = vpop.f32.mrf.mxu0 }
 0x10c   :  { %v396_v9 = vpop.f32.mrf.mxu1 }
 0x10d   :  { %505 = vst [vmem:[#allocation7 + $0xd8] sm:$0xff] %v473_v7  ;;  %v458_v10 = vpack.c.bf16 %v396_v9, %v307_v8 }
 0x10f   :  { %490 = vst [vmem:[#allocation7 + $0x60] sm:$0xff] %v458_v10 }
 0x111   :  { %v347_v11 = vpop.f32.mrf.mxu2 }
 0x112   :  { %v436_v12 = vpop.f32.mrf.mxu3 }
 0x113   :  { %v474_v13 = vpack.c.bf16 %v436_v12, %v347_v11  ;;  %v309_v14 = vpop.f32.mrf.mxu0 }
 0x114   :  { %v398_v15 = vpop.f32.mrf.mxu1 }
 0x115   :  { %506 = vst [vmem:[#allocation7 + $0xe0] sm:$0xff] %v474_v13  ;;  %v459_v16 = vpack.c.bf16 %v398_v15, %v309_v14 }
 0x117   :  { %491 = vst [vmem:[#allocation7 + $0x68] sm:$0xff] %v459_v16 }
 0x119   :  { %v349_v17 = vpop.f32.mrf.mxu2 }
 0x11a   :  { %v438_v18 = vpop.f32.mrf.mxu3 }
 0x11b   :  { %v475_v19 = vpack.c.bf16 %v438_v18, %v349_v17  ;;  %v312_v20 = vpop.f32.mrf.mxu0 }
 0x11c   :  { %v401_v21 = vpop.f32.mrf.mxu1 }
 0x11d   :  { %507 = vst [vmem:[#allocation7 + $0xe8] sm:$0xff] %v475_v19  ;;  %v460_v22 = vpack.c.bf16 %v401_v21, %v312_v20 }
 0x11f   :  { %492 = vst [vmem:[#allocation7 + $0x70] sm:$0xff] %v460_v22 }
 0x121   :  { %v352_v23 = vpop.f32.mrf.mxu2 }
 0x122   :  { %v441_v24 = vpop.f32.mrf.mxu3 }
 0x123   :  { %v476_v25 = vpack.c.bf16 %v441_v24, %v352_v23  ;;  %v314_v26 = vpop.f32.mrf.mxu0 }
 0x124   :  { %v403_v27 = vpop.f32.mrf.mxu1 }
 0x125   :  { %508 = vst [vmem:[#allocation7 + $0xf0] sm:$0xff] %v476_v25  ;;  %v461_v28 = vpack.c.bf16 %v403_v27, %v314_v26 }
 0x127   :  { %493 = vst [vmem:[#allocation7 + $0x78] sm:$0xff] %v461_v28 }
 0x129   :  { %v354_v29 = vpop.f32.mrf.mxu2 }
 0x12a   :  { %v443_v30 = vpop.f32.mrf.mxu3 }
 0x12b   :  { %v477_v31 = vpack.c.bf16 %v443_v30, %v354_v29 }
 0x12d   :  { %509 = vst [vmem:[#allocation7 + $0xf8] sm:$0xff] %v477_v31 }
 0x12e   :  { %522 = dma.vmem_to_hbm [thread:$0]  %s515_s1, 4096, %s517_s25, [#allocation4], %s795_s21, %s795_s21, %s796_s22  }
 0x12f   :  { %789 = dma.done.wait [#allocation4], 4096  }
 0x130   :  { %790 = vsyncadd [#allocation4], 4294963200 }
 0x131   :  { %527 = vsyncpa [#allocation3], 1 }
 0x132   :  { %528 = vsyncpa [#allocation6], 1 }
 0x133   :  { %529 = vsyncpa [#allocation4], 1 }

</bundles_post_ra>
